<compile_context>
chip_gen: v7x
topology: tpu7x:2x2x1
jax: 0.10.0
libtpu: 0.0.40
codegen_flags: <defaults>
</compile_context>

<pallas_src>
import functools

import jax
import jax.numpy as jnp
from jax import lax
from jax.experimental import pallas as pl
from jax.experimental.pallas import tpu as pltpu


def _layernorm_f32(x_f32, g, b, eps):
    mu = jnp.mean(x_f32, axis=-1, keepdims=True)
    xc = x_f32 - mu
    var = jnp.mean(xc * xc, axis=-1, keepdims=True)
    return xc * lax.rsqrt(var + eps) * g + b


# ---------------------------------------------------------------------------
# Kernel 1: LayerNorm(norm1) + per-head K / V projection (Q is fused later).
# ---------------------------------------------------------------------------
def _ln1_kv_kernel(x_ref, g_ref, b_ref, wk_ref, wv_ref, k_ref, v_ref, xn_sc,
                   *, eps):
    h = pl.program_id(2)

    # Heads are the innermost ("arbitrary") axis: LN once per (batch, q-tile).
    @pl.when(h == 0)
    def _():
        xn = _layernorm_f32(x_ref[...].astype(jnp.float32),
                            g_ref[...], b_ref[...], eps)
        xn_sc[...] = xn.astype(xn_sc.dtype)

    xn = xn_sc[...]                                              # (tq, C)
    # Whole (H, C, hd) weight arrays stay VMEM-resident; index the head here.
    k_ref[...] = jnp.dot(xn, wk_ref[h],
                         preferred_element_type=jnp.float32).astype(k_ref.dtype)
    v_ref[...] = jnp.dot(xn, wv_ref[h],
                         preferred_element_type=jnp.float32).astype(v_ref.dtype)


# ---------------------------------------------------------------------------
# Kernel 2: attention (exact softmax, whole-row keys) + proj + residual
#           + LN2 + MLP + AdaptFormer adapter + residuals (fused epilogue).
# ---------------------------------------------------------------------------
def _attn_mlp_kernel(x_ref, k_ref, v_ref,
                     g1_ref, be1_ref, wq_ref, wo_ref, bo_ref,
                     g2_ref, be2_ref, w1_ref, b1_ref, w2_ref, b2_ref,
                     wd_ref, bd_ref, wu_ref, bu_ref,
                     o_ref, xn_sc, oacc_sc,
                     *, eps, adapter_scale, compute_dtype):
    h = pl.program_id(2)
    nh = pl.num_programs(2)

    # Fresh (batch, q-tile): LN1 into scratch, zero the projected accumulator.
    @pl.when(h == 0)
    def _():
        xn = _layernorm_f32(x_ref[...].astype(jnp.float32),
                            g1_ref[...], be1_ref[...], eps)
        xn_sc[...] = xn.astype(xn_sc.dtype)
        oacc_sc[...] = jnp.zeros_like(oacc_sc)

    xn = xn_sc[...]                                              # (tq, C)
    # Q projection fused here; softmax scale is pre-folded into wq on the host.
    q = jnp.dot(xn, wq_ref[h],
                preferred_element_type=jnp.float32).astype(compute_dtype)
    k = k_ref[h]                                                 # (N, hd)
    v = v_ref[h]                                                 # (N, hd)

    # q @ k^T without an explicit transpose: contract the last dims of both.
    s = lax.dot_general(q, k, (((1,), (1,)), ((), ())),
                        preferred_element_type=jnp.float32)      # (tq, N) f32
    m = jnp.max(s, axis=-1, keepdims=True)
    p = jnp.exp(s - m)
    l = jnp.sum(p, axis=-1, keepdims=True)
    head = jnp.dot(p.astype(compute_dtype), v,
                   preferred_element_type=jnp.float32)           # (tq, hd)
    head = (head * pl.reciprocal(l, approx=True)).astype(compute_dtype)
    # Per-head output projection accumulated into a lane-dense (tq, C) scratch.
    oacc_sc[...] += jnp.dot(head, wo_ref[h],
                            preferred_element_type=jnp.float32)

    # Last head: finish attention, then run LN2 + MLP + adapter + residuals
    # directly on the VMEM-resident x1 tile (no HBM round trip, no 3rd kernel).
    @pl.when(h == nh - 1)
    def _():
        x1 = x_ref[...].astype(jnp.float32) + oacc_sc[...] + bo_ref[...]

        # norm2 + MLP.
        xn2 = _layernorm_f32(x1, g2_ref[...], be2_ref[...], eps).astype(compute_dtype)
        h1 = jnp.dot(xn2, w1_ref[...],
                     preferred_element_type=jnp.float32) + b1_ref[...]
        # TODO(synk): PyTorch nn.GELU() default is the exact erf GELU; the tanh
        # approximation used here differs by <~1e-3.
        h1 = jax.nn.gelu(h1, approximate=True).astype(compute_dtype)
        mlp = jnp.dot(h1, w2_ref[...],
                      preferred_element_type=jnp.float32) + b2_ref[...]

        # AdaptFormer adapter (layernorm_option='none'), bottleneck zero-padded
        # to 128 lanes on the host (mathematically exact).
        a = x1.astype(compute_dtype)
        dn = jnp.dot(a, wd_ref[...],
                     preferred_element_type=jnp.float32) + bd_ref[...]
        dn = jnp.maximum(dn, 0.0).astype(compute_dtype)
        up = jnp.dot(dn, wu_ref[...],
                     preferred_element_type=jnp.float32) + bu_ref[...]

        o_ref[...] = (mlp + x1 + up * adapter_scale).astype(o_ref.dtype)


# ---------------------------------------------------------------------------
# Host-side weight prep (one-time layout work).
# ---------------------------------------------------------------------------
def _prep_weights(params, num_heads, compute_dtype):
    C = params["w_qkv"].shape[0]
    H = num_heads
    hd = C // H
    scale = hd ** -0.5

    def per_head(block):                        # (C, C) -> (H, C, hd)
        return block.reshape(C, H, hd).transpose(1, 0, 2)

    w_qkv = params["w_qkv"]
    # Softmax scale folded into wq (removes a per-step VPU multiply).
    wq = (per_head(w_qkv[:, 0 * C:1 * C]) * scale).astype(compute_dtype)
    wk = per_head(w_qkv[:, 1 * C:2 * C]).astype(compute_dtype)
    wv = per_head(w_qkv[:, 2 * C:3 * C]).astype(compute_dtype)
    wo = params["w_proj"].reshape(H, hd, C).astype(compute_dtype)

    fc1_w = params["fc1_w"].astype(compute_dtype)
    fc2_w = params["fc2_w"].astype(compute_dtype)

    # Zero-pad the adapter bottleneck to a multiple of 128 lanes (exact).
    Dn = params["down_w"].shape[1]
    Dp = ((Dn + 127) // 128) * 128
    pad = Dp - Dn
    down_w = jnp.pad(params["down_w"], ((0, 0), (0, pad))).astype(compute_dtype)
    down_b = jnp.pad(params["down_b"], ((0, 0), (0, pad)))
    up_w = jnp.pad(params["up_w"], ((0, pad), (0, 0))).astype(compute_dtype)

    return wq, wk, wv, wo, fc1_w, fc2_w, down_w, down_b, up_w


# ---------------------------------------------------------------------------
# Wrapper
# ---------------------------------------------------------------------------
def adapterformer_block_forward(x, params, *, num_heads,
                                compute_dtype=jnp.bfloat16,
                                q_block=256,
                                adapter_scale=0.1, eps=1e-5,
                                vmem_limit_bytes=48 * 1024 * 1024,
                                single_buffer_weights=False):
    """Forward of the AdapterFormer `Block` (eval mode, num_domains=1)."""
    B, N, C = x.shape
    H = num_heads
    assert C % H == 0
    hd = C // H

    tq = min(q_block, N)
    assert N % tq == 0, "sequence length must be a multiple of the q tile"
    nq = N // tq

    (wq, wk, wv, wo, fc1_w, fc2_w,
     down_w, down_b, up_w) = _prep_weights(params, H, compute_dtype)
    Hm = fc1_w.shape[1]
    Dp = down_w.shape[1]

    # Grid-invariant (resident) weight specs; optionally single-buffered to
    # halve their VMEM footprint (v7x 64 MiB budget).
    if single_buffer_weights:
        def wspec(shape, index_map):
            return pl.BlockSpec(shape, index_map, pipeline_mode=pl.Buffered(1))
    else:
        def wspec(shape, index_map):
            return pl.BlockSpec(shape, index_map)

    cparams = pltpu.CompilerParams(
        dimension_semantics=("parallel", "parallel", "arbitrary"),
        vmem_limit_bytes=vmem_limit_bytes)

    # ---- 1) LN1 + per-head K / V projections --------------------------------
    k, v = pl.pallas_call(
        functools.partial(_ln1_kv_kernel, eps=eps),
        out_shape=(jax.ShapeDtypeStruct((B, H, N, hd), compute_dtype),) * 2,
        grid=(B, nq, H),
        in_specs=[
            pl.BlockSpec((pl.Squeezed(), tq, C), lambda b, i, h: (b, i, 0)),
            pl.BlockSpec((1, C), lambda b, i, h: (0, 0)),
            pl.BlockSpec((1, C), lambda b, i, h: (0, 0)),
            wspec((H, C, hd), lambda b, i, h: (0, 0, 0)),   # wk (resident)
            wspec((H, C, hd), lambda b, i, h: (0, 0, 0)),   # wv (resident)
        ],
        out_specs=(
            pl.BlockSpec((pl.Squeezed(), pl.Squeezed(), tq, hd),
                         lambda b, i, h: (b, h, i, 0)),
        ) * 2,
        scratch_shapes=[pltpu.VMEM((tq, C), compute_dtype)],
        compiler_params=cparams,
    )(x, params["ln1_g"], params["ln1_b"], wk, wv)

    # ---- 2) attention + proj + residual + LN2 + MLP + adapter (fused) --------
    out = pl.pallas_call(
        functools.partial(_attn_mlp_kernel, eps=eps,
                          adapter_scale=adapter_scale,
                          compute_dtype=compute_dtype),
        out_shape=jax.ShapeDtypeStruct((B, N, C), x.dtype),
        grid=(B, nq, H),
        in_specs=[
            pl.BlockSpec((pl.Squeezed(), tq, C), lambda b, i, h: (b, i, 0)),      # x
            # Whole-sequence K/V per batch element: fetched once per b, resident
            # across all q-tiles and heads (no redundant re-DMA).
            pl.BlockSpec((pl.Squeezed(), H, N, hd), lambda b, i, h: (b, 0, 0, 0)),
            pl.BlockSpec((pl.Squeezed(), H, N, hd), lambda b, i, h: (b, 0, 0, 0)),
            pl.BlockSpec((1, C), lambda b, i, h: (0, 0)),     # ln1 gamma
            pl.BlockSpec((1, C), lambda b, i, h: (0, 0)),     # ln1 beta
            wspec((H, C, hd), lambda b, i, h: (0, 0, 0)),     # wq (scale folded)
            wspec((H, hd, C), lambda b, i, h: (0, 0, 0)),     # wo
            pl.BlockSpec((1, C), lambda b, i, h: (0, 0)),     # proj bias
            pl.BlockSpec((1, C), lambda b, i, h: (0, 0)),     # ln2 gamma
            pl.BlockSpec((1, C), lambda b, i, h: (0, 0)),     # ln2 beta
            wspec((C, Hm), lambda b, i, h: (0, 0)),           # fc1 w
            pl.BlockSpec((1, Hm), lambda b, i, h: (0, 0)),    # fc1 b
            wspec((Hm, C), lambda b, i, h: (0, 0)),           # fc2 w
            pl.BlockSpec((1, C), lambda b, i, h: (0, 0)),     # fc2 b
            wspec((C, Dp), lambda b, i, h: (0, 0)),           # adapter down w (padded)
            pl.BlockSpec((1, Dp), lambda b, i, h: (0, 0)),    # adapter down b (padded)
            wspec((Dp, C), lambda b, i, h: (0, 0)),           # adapter up w (padded)
            pl.BlockSpec((1, C), lambda b, i, h: (0, 0)),     # adapter up b
        ],
        out_specs=pl.BlockSpec((pl.Squeezed(), tq, C), lambda b, i, h: (b, i, 0)),
        scratch_shapes=[
            pltpu.VMEM((tq, C), compute_dtype),   # LN1(x) tile, reused per head
            pltpu.VMEM((tq, C), jnp.float32),     # projected attention accumulator
        ],
        compiler_params=cparams,
    )(x, k, v,
      params["ln1_g"], params["ln1_b"], wq, wo, params["b_proj"],
      params["ln2_g"], params["ln2_b"],
      fc1_w, params["fc1_b"], fc2_w, params["fc2_b"],
      down_w, down_b, up_w, params["up_b"])
    return out


# ---------------------------------------------------------------------------
# Pure-JAX reference mirroring the PyTorch Block forward (eval semantics).
# ---------------------------------------------------------------------------
def block_reference(x, params, *, num_heads, adapter_scale=0.1, eps=1e-5):
    def ln(v, g, b):
        mu = v.mean(-1, keepdims=True)
        var = ((v - mu) ** 2).mean(-1, keepdims=True)
        return (v - mu) / jnp.sqrt(var + eps) * g + b

    B, N, C = x.shape
    hd = C // num_heads
    scale = hd ** -0.5

    xn = ln(x, params["ln1_g"], params["ln1_b"])
    qkv = (xn @ params["w_qkv"]).reshape(B, N, 3, num_heads, hd)
    qkv = qkv.transpose(2, 0, 3, 1, 4)
    q, k, v = qkv[0], qkv[1], qkv[2]
    attn = jax.nn.softmax((q @ jnp.swapaxes(k, -1, -2)) * scale, axis=-1)
    att = (attn @ v).transpose(0, 2, 1, 3).reshape(B, N, C)
    x1 = x + att @ params["w_proj"] + params["b_proj"]

    adapt = jnp.maximum(x1 @ params["down_w"] + params["down_b"], 0.0)
    adapt = (adapt @ params["up_w"] + params["up_b"]) * adapter_scale

    h = jax.nn.gelu(ln(x1, params["ln2_g"], params["ln2_b"]) @ params["fc1_w"]
                    + params["fc1_b"], approximate=True)
    mlp = h @ params["fc2_w"] + params["fc2_b"]
    return mlp + x1 + adapt


if __name__ == "__main__":
    B, N, C = 2, 8, 32
    num_heads = 4
    mlp_hidden = 4 * C
    bottleneck = 16
    adapter_scale = 0.1

    key = jax.random.PRNGKey(0)
    keys = jax.random.split(key, 16)

    def rnd(k, shape, s=1.0):
        return jax.random.normal(k, shape, dtype=jnp.float32) * s

    x = rnd(keys[0], (B, N, C))
    params = dict(
        ln1_g=1.0 + 0.1 * rnd(keys[1], (1, C)),
        ln1_b=0.1 * rnd(keys[2], (1, C)),
        w_qkv=rnd(keys[3], (C, 3 * C), C ** -0.5),
        w_proj=rnd(keys[4], (C, C), C ** -0.5),
        b_proj=0.02 * rnd(keys[5], (1, C)),
        ln2_g=1.0 + 0.1 * rnd(keys[6], (1, C)),
        ln2_b=0.1 * rnd(keys[7], (1, C)),
        fc1_w=rnd(keys[8], (C, mlp_hidden), C ** -0.5),
        fc1_b=0.02 * rnd(keys[9], (1, mlp_hidden)),
        fc2_w=rnd(keys[10], (mlp_hidden, C), mlp_hidden ** -0.5),
        fc2_b=0.02 * rnd(keys[11], (1, C)),
        down_w=rnd(keys[12], (C, bottleneck), C ** -0.5),
        down_b=0.02 * rnd(keys[13], (1, bottleneck)),
        up_w=rnd(keys[14], (bottleneck, C), bottleneck ** -0.5),
        up_b=0.02 * rnd(keys[15], (1, C)),
    )

    ref = block_reference(x, params, num_heads=num_heads,
                          adapter_scale=adapter_scale)

    # f32 MXU operands: tight(ish) check validates the kernel math
    # (tolerance leaves room for the approx softmax reciprocal).
    out_f32 = adapterformer_block_forward(
        x, params, num_heads=num_heads, compute_dtype=jnp.float32,
        adapter_scale=adapter_scale)
    out_f32 = jax.block_until_ready(out_f32)
    assert out_f32.shape == (B, N, C)
    assert jnp.allclose(out_f32, ref, atol=1e-2, rtol=1e-2), \
        float(jnp.max(jnp.abs(out_f32 - ref)))

    # bf16 MXU operands (v6e/v7x fast path, f32 accumulation): looser tolerance.
    out_bf16 = adapterformer_block_forward(
        x, params, num_heads=num_heads, compute_dtype=jnp.bfloat16,
        adapter_scale=adapter_scale)
    out_bf16 = jax.block_until_ready(out_bf16)
    assert jnp.allclose(out_bf16, ref, atol=0.25, rtol=0.05), \
        float(jnp.max(jnp.abs(out_bf16 - ref)))

    # Optional v7x VMEM-budget path: single-buffered resident weights.  Falls
    # back silently if this jax/libtpu build does not support pipeline_mode.
    out_sb = None
    try:
        out_sb = adapterformer_block_forward(
            x, params, num_heads=num_heads, compute_dtype=jnp.float32,
            adapter_scale=adapter_scale, single_buffer_weights=True)
        out_sb = jax.block_until_ready(out_sb)
    except Exception:  # pragma: no cover - pipeline_mode/Buffered unsupported
        out_sb = None
    if out_sb is not None:
        assert jnp.allclose(out_sb, ref, atol=1e-2, rtol=1e-2), \
            float(jnp.max(jnp.abs(out_sb - ref)))

    print("KERNEL_OK")
</pallas_src>

<mosaic_0001>
module attributes {stable_mosaic.version = 11 : i64} {
  func.func @_ln1_kv_kernel(%arg0: i32, %arg1: i32, %arg2: i32, %arg3: memref<1x8x32xf32, #tpu.memory_space<vmem>>, %arg4: memref<1x32xf32, #tpu.memory_space<vmem>>, %arg5: memref<1x32xf32, #tpu.memory_space<vmem>>, %arg6: memref<4x32x8xf32, #tpu.memory_space<vmem>>, %arg7: memref<4x32x8xf32, #tpu.memory_space<vmem>>, %arg8: memref<1x1x8x8xf32, #tpu.memory_space<vmem>>, %arg9: memref<1x1x8x8xf32, #tpu.memory_space<vmem>>, %arg10: memref<8x32xf32, #tpu.memory_space<vmem>>) attributes {dimension_semantics = [#tpu.dimension_semantics<parallel>, #tpu.dimension_semantics<parallel>, #tpu.dimension_semantics<arbitrary>], iteration_bounds = array<i64: 2, 1, 4>, scalar_prefetch = 0 : i64, scratch_operands = 1 : i64, tpu.core_type = #tpu.core_type<tc>, window_params = [{transform_indices = @transform_0, window_bounds = array<i64: 1, 8, 32>}, {pipeline_mode = #tpu.pipeline_mode<synchronous>, transform_indices = @transform_1, window_bounds = array<i64: 1, 32>}, {pipeline_mode = #tpu.pipeline_mode<synchronous>, transform_indices = @transform_2, window_bounds = array<i64: 1, 32>}, {pipeline_mode = #tpu.pipeline_mode<synchronous>, transform_indices = @transform_3, window_bounds = array<i64: 4, 32, 8>}, {pipeline_mode = #tpu.pipeline_mode<synchronous>, transform_indices = @transform_4, window_bounds = array<i64: 4, 32, 8>}, {transform_indices = @transform_5, window_bounds = array<i64: 1, 1, 8, 8>}, {transform_indices = @transform_6, window_bounds = array<i64: 1, 1, 8, 8>}]} {
    %c0_i32 = arith.constant 0 : i32
    %0 = arith.cmpi eq, %arg2, %c0_i32 : i32
    %1 = arith.extui %0 : i1 to i32
    %c0_i32_0 = arith.constant 0 : i32
    %2 = arith.cmpi ne, %1, %c0_i32_0 : i32
    scf.if %2 {
      %c0_15 = arith.constant 0 : index
      %c0_16 = arith.constant 0 : index
      %c0_17 = arith.constant 0 : index
      %18 = vector.load %arg3[%c0_15, %c0_16, %c0_17] : memref<1x8x32xf32, #tpu.memory_space<vmem>>, vector<1x8x32xf32>
      %19 = vector.shape_cast %18 : vector<1x8x32xf32> to vector<8x32xf32>
      %c0_18 = arith.constant 0 : index
      %c0_19 = arith.constant 0 : index
      %20 = vector.load %arg4[%c0_18, %c0_19] : memref<1x32xf32, #tpu.memory_space<vmem>>, vector<1x32xf32>
      %c0_20 = arith.constant 0 : index
      %c0_21 = arith.constant 0 : index
      %21 = vector.load %arg5[%c0_20, %c0_21] : memref<1x32xf32, #tpu.memory_space<vmem>>, vector<1x32xf32>
      %cst_22 = arith.constant dense<0.000000e+00> : vector<8xf32>
      %22 = vector.multi_reduction <add>, %19, %cst_22 [1] : vector<8x32xf32> to vector<8xf32>
      %23 = vector.shape_cast %22 : vector<8xf32> to vector<8x1xf32>
      %cst_23 = arith.constant 3.200000e+01 : f32
      %24 = vector.broadcast %cst_23 : f32 to vector<8x1xf32>
      %25 = arith.divf %23, %24 : vector<8x1xf32>
      %26 = vector.broadcast %25 : vector<8x1xf32> to vector<8x32xf32>
      %27 = arith.subf %19, %26 : vector<8x32xf32>
      %28 = arith.mulf %27, %27 : vector<8x32xf32>
      %cst_24 = arith.constant dense<0.000000e+00> : vector<8xf32>
      %29 = vector.multi_reduction <add>, %28, %cst_24 [1] : vector<8x32xf32> to vector<8xf32>
      %30 = vector.shape_cast %29 : vector<8xf32> to vector<8x1xf32>
      %cst_25 = arith.constant 3.200000e+01 : f32
      %31 = vector.broadcast %cst_25 : f32 to vector<8x1xf32>
      %32 = arith.divf %30, %31 : vector<8x1xf32>
      %cst_26 = arith.constant 9.99999974E-6 : f32
      %33 = vector.broadcast %cst_26 : f32 to vector<8x1xf32>
      %34 = arith.addf %32, %33 : vector<8x1xf32>
      %35 = math.rsqrt %34 : vector<8x1xf32>
      %36 = vector.broadcast %35 : vector<8x1xf32> to vector<8x32xf32>
      %37 = arith.mulf %27, %36 : vector<8x32xf32>
      %38 = vector.broadcast %20 : vector<1x32xf32> to vector<8x32xf32>
      %39 = arith.mulf %37, %38 : vector<8x32xf32>
      %40 = vector.broadcast %21 : vector<1x32xf32> to vector<8x32xf32>
      %41 = arith.addf %39, %40 : vector<8x32xf32>
      %c0_27 = arith.constant 0 : index
      %c0_28 = arith.constant 0 : index
      %42 = vector.load %arg10[%c0_27, %c0_28] : memref<8x32xf32, #tpu.memory_space<vmem>>, vector<8x32xf32>
      tpu.vector_store %arg10[%c0_27, %c0_28], %41 {strides = array<i32>} : memref<8x32xf32, #tpu.memory_space<vmem>>, vector<8x32xf32>,
    } else {
    }
    %c0 = arith.constant 0 : index
    %c0_1 = arith.constant 0 : index
    %3 = vector.load %arg10[%c0, %c0_1] : memref<8x32xf32, #tpu.memory_space<vmem>>, vector<8x32xf32>
    %4 = arith.index_cast %arg2 : i32 to index
    %c0_2 = arith.constant 0 : index
    %c0_3 = arith.constant 0 : index
    %5 = vector.load %arg6[%4, %c0_2, %c0_3] : memref<4x32x8xf32, #tpu.memory_space<vmem>>, vector<1x32x8xf32>
    %6 = vector.shape_cast %5 : vector<1x32x8xf32> to vector<32x8xf32>
    %cst = arith.constant dense<0.000000e+00> : vector<8x8xf32>
    %7 = tpu.matmul %3, %6, %cst {dimension_numbers = #tpu.dot_dimension_numbers<[1], [0], [0], [1], [0, 0, 1, 1], [], []>} : vector<8x32xf32>, vector<32x8xf32>, vector<8x8xf32> -> vector<8x8xf32>
    %c0_4 = arith.constant 0 : index
    %c0_5 = arith.constant 0 : index
    %c0_6 = arith.constant 0 : index
    %c0_7 = arith.constant 0 : index
    %8 = vector.load %arg8[%c0_4, %c0_5, %c0_6, %c0_7] : memref<1x1x8x8xf32, #tpu.memory_space<vmem>>, vector<1x1x8x8xf32>
    %9 = vector.shape_cast %8 : vector<1x1x8x8xf32> to vector<8x8xf32>
    %10 = vector.shape_cast %7 : vector<8x8xf32> to vector<1x1x8x8xf32>
    tpu.vector_store %arg8[%c0_4, %c0_5, %c0_6, %c0_7], %10 {strides = array<i32>} : memref<1x1x8x8xf32, #tpu.memory_space<vmem>>, vector<1x1x8x8xf32>,
    %11 = arith.index_cast %arg2 : i32 to index
    %c0_8 = arith.constant 0 : index
    %c0_9 = arith.constant 0 : index
    %12 = vector.load %arg7[%11, %c0_8, %c0_9] : memref<4x32x8xf32, #tpu.memory_space<vmem>>, vector<1x32x8xf32>
    %13 = vector.shape_cast %12 : vector<1x32x8xf32> to vector<32x8xf32>
    %cst_10 = arith.constant dense<0.000000e+00> : vector<8x8xf32>
    %14 = tpu.matmul %3, %13, %cst_10 {dimension_numbers = #tpu.dot_dimension_numbers<[1], [0], [0], [1], [0, 0, 1, 1], [], []>} : vector<8x32xf32>, vector<32x8xf32>, vector<8x8xf32> -> vector<8x8xf32>
    %c0_11 = arith.constant 0 : index
    %c0_12 = arith.constant 0 : index
    %c0_13 = arith.constant 0 : index
    %c0_14 = arith.constant 0 : index
    %15 = vector.load %arg9[%c0_11, %c0_12, %c0_13, %c0_14] : memref<1x1x8x8xf32, #tpu.memory_space<vmem>>, vector<1x1x8x8xf32>
    %16 = vector.shape_cast %15 : vector<1x1x8x8xf32> to vector<8x8xf32>
    %17 = vector.shape_cast %14 : vector<8x8xf32> to vector<1x1x8x8xf32>
    tpu.vector_store %arg9[%c0_11, %c0_12, %c0_13, %c0_14], %17 {strides = array<i32>} : memref<1x1x8x8xf32, #tpu.memory_space<vmem>>, vector<1x1x8x8xf32>,
    return
  }
  func.func @transform_0(%arg0: i32, %arg1: i32, %arg2: i32) -> (i32, i32, i32) {
    %c0_i32 = arith.constant 0 : i32
    %c0_i32_0 = arith.constant 0 : i32
    return %arg0, %arg1, %c0_i32 : i32, i32, i32
  }
  func.func @transform_1(%arg0: i32, %arg1: i32, %arg2: i32) -> (i32, i32) {
    %c0_i32 = arith.constant 0 : i32
    %c0_i32_0 = arith.constant 0 : i32
    %c0_i32_1 = arith.constant 0 : i32
    return %c0_i32, %c0_i32_0 : i32, i32
  }
  func.func @transform_2(%arg0: i32, %arg1: i32, %arg2: i32) -> (i32, i32) {
    %c0_i32 = arith.constant 0 : i32
    %c0_i32_0 = arith.constant 0 : i32
    %c0_i32_1 = arith.constant 0 : i32
    return %c0_i32, %c0_i32_0 : i32, i32
  }
  func.func @transform_3(%arg0: i32, %arg1: i32, %arg2: i32) -> (i32, i32, i32) {
    %c0_i32 = arith.constant 0 : i32
    %c0_i32_0 = arith.constant 0 : i32
    %c0_i32_1 = arith.constant 0 : i32
    %c0_i32_2 = arith.constant 0 : i32
    return %c0_i32, %c0_i32_0, %c0_i32_1 : i32, i32, i32
  }
  func.func @transform_4(%arg0: i32, %arg1: i32, %arg2: i32) -> (i32, i32, i32) {
    %c0_i32 = arith.constant 0 : i32
    %c0_i32_0 = arith.constant 0 : i32
    %c0_i32_1 = arith.constant 0 : i32
    %c0_i32_2 = arith.constant 0 : i32
    return %c0_i32, %c0_i32_0, %c0_i32_1 : i32, i32, i32
  }
  func.func @transform_5(%arg0: i32, %arg1: i32, %arg2: i32) -> (i32, i32, i32, i32) {
    %c0_i32 = arith.constant 0 : i32
    %c0_i32_0 = arith.constant 0 : i32
    return %arg0, %arg2, %arg1, %c0_i32 : i32, i32, i32, i32
  }
  func.func @transform_6(%arg0: i32, %arg1: i32, %arg2: i32) -> (i32, i32, i32, i32) {
    %c0_i32 = arith.constant 0 : i32
    %c0_i32_0 = arith.constant 0 : i32
    return %arg0, %arg2, %arg1, %c0_i32 : i32, i32, i32, i32
  }
}

</mosaic_0001>

<bundles_post_ra>
// kernel: tpu_custom_call.1
= control target key start
LH: loop header
LB: loop body
LE: loop exit
PB: predicated region body
PF: predicated region fallthrough
CT: control target
= control target key end

     0   :  { %s1156_s0 = inlined_call_operand.vmem [shape: f32[2,8,32], index: 0, kind: input, shape index: {}]   ;;  %s1157_s1 = inlined_call_operand.vmem [shape: f32[1,32], index: 1, kind: input, shape index: {}]   ;;  %s1158_s2 = inlined_call_operand.vmem [shape: f32[1,32], index: 2, kind: input, shape index: {}]   ;;  %s1159_s3 = inlined_call_operand.vmem [shape: f32[4,32,8], index: 3, kind: input, shape index: {}]   ;;  %s1160_s4 = inlined_call_operand.vmem [shape: f32[4,32,8], index: 4, kind: input, shape index: {}]   ;;  %s1161_s5 = inlined_call_operand.hbm [shape: f32[2,4,8,8], index: 5, kind: output, shape index: {0}]   ;;  %s1162_s6 = inlined_call_operand.hbm [shape: f32[2,4,8,8], index: 6, kind: output, shape index: {1}]  }
   0x1   :  { %1163 = sst [smem:[#allocation9_spill]] %s1156_s0 }
   0x2   :  { %1164 = sst [smem:[#allocation10_spill]] %s1157_s1 }
   0x3   :  { %12 = vsyncpa [#allocation4], 0 }
   0x4   :  { %14 = vsyncpa [#allocation4 + $0x1], 0 }
   0x5   :  { %15 = vsyncpa [#allocation6], 0 }
   0x6   :  { %17 = vsyncpa [#allocation6 + $0x1], 0  ;;  %s963_s21 = smov 0   ;;  %s965_s22 = smov 0  }
   0x7   :  { %s967_s23 = smov 0   ;;  %s969_s24 = smov 0  }
   0x8   :  { %s971_s25 = smov 0   ;;  %s973_s26 = smov 0  }
   0x9   :  { %s975_s27 = smov 0   ;;  %s977_s28 = smov 0  }
   0xa LB: > { %s648_s29 = sadd.s32 4294967295, %s921_s28   ;;  %s649_s30 = sadd.s32 4294967294, %s921_s28   ;;  %s921_s28 = sphi %s977_s28, %s23_s28   ;;  %s917_s27 = sphi %s975_s27, %s1175_s27   ;;  %s913_s26 = sphi %s973_s26, %s1174_s26   ;;  %s909_s25 = sphi %s971_s25, %s1173_s25   ;;  %s905_s24 = sphi %s969_s24, %s1172_s24   ;;  %s901_s23 = sphi %s967_s23, %s1171_s23   ;;  %s897_s22 = sphi %s965_s22, %s1170_s22   ;;  %s893_s21 = sphi %s963_s21, %s1169_s21  }
   0xb   : > { %s35_s7 = sadd.s32 1, %s913_s26  ;;  %s42_s8 = sadd.s32 1, %s917_s27 }
   0xc   : > { %p36_p0 = scmp.ge.s32.totalorder %s35_s7, 4  ;;  %p175_p1 = scmp.ne.s32.totalorder %s901_s23, %s897_s22 }
   0xd   : > { %p176_p2 = scmp.eq.s32.totalorder %s648_s29, 7  ;;  %p181_p5 = scmp.ne.s32.totalorder %s897_s22, %s893_s21 }
   0xe   : > { %s1177_s7 = smov (%p36_p0, %s35_s7), 0  ;;  %s1179_s8 = smov (!%p36_p0, %s42_s8), %s917_s27 }
   0xf   : > { %s159_s9 = ssub.s32 %s913_s26, %s1177_s7  ;;  %p1014_p3 = por %p176_p2, %p175_p1 }
  0x10   : > { %p44_p4 = scmp.ge.s32.totalorder %s1179_s8, 2  ;;  %p182_p6 = scmp.eq.s32.totalorder %s649_s30, 7 }
  0x11   : > { %p652_p7 = scmp.ge.s32.totalorder %s921_s28, 1  ;;  %p252_p9 = scmp.lt.s32.totalorder %s921_s28, 9 }
  0x12   : > { %s1181_s8 = smov (%p44_p4, %s1179_s8), 0  ;;  %p1023_p8 = por %p182_p6, %p181_p5 }
  0x13   : > { %s158_s12 = ssub.s32 %s917_s27, %s1181_s8  ;;  %s165_s13 = sadd.s32 1, %s901_s23 }
  0x14   : > { %s160_s14 = sor.u32 %s159_s9, %s158_s12  ;;  %p253_p10 = pnand %p652_p7, %p252_p9 }
  0x15   : > { %p163_p11 = scmp.eq.s32.totalorder %s160_s14, 0  ;;  %s1035_s16 = sand.u32 (!%p253_p10), 1, %s897_s22  }
  0x16   : > { %256 = sbr.rel (%p253_p10) target bundleno = 610 (0x262), region = 40  ;;  %p289_p12 = scmp.lt.s32.totalorder (!%p253_p10), %s909_s25, 1 }
  0x17   : > { %s1032_s15 = scalar_select %p163_p11, %s901_s23, %s165_s13  }
  0x18   : > { %s653_s17 = sshll.u32 (!%p253_p10), %s1035_s16, 3  ;;  %s1167_s0 = sld [smem:[#allocation9_spill]] (!%p253_p10) }
  0x19   : > { %s1043_s9 = scalar_lea.vmem (!%p253_p10), [#allocation3], %s653_s17  ;;  %s1045_s12 = scalar_lea.vmem (!%p253_p10), [#allocation5], %s653_s17 }
  0x1a   : > { %p656_p13 = scmp.ne.s32.totalorder (!%p253_p10), %s905_s24, 0 }
  0x1d   : > { %s290_s18 = scalar_select %p289_p12, %s909_s25, 1 }
  0x1e   : > { %299 = sbr.rel (%p656_p13) target bundleno = 348 (0x15c), region = 44  ;;  %vm303_vm0 = vcmask (!%p656_p13), 261120   ;;  %s1168_s1 = sld [smem:[#allocation10_spill]] (!%p656_p13)  ;;  %v658_v13 = vld [vmem:[%s1158_s2] ss:$0 sm:$0xff] (!%p656_p13) }
  0x1f   : > { %s655_s19 = sshll.u32 %s290_s18, 3 }
  0x20   : > { %s295_s30 = scalar_lea.vmem %s1167_s0, %s655_s19 }
  0x21   : > { %v300_v0 = vld [vmem:[%s295_s30] sm:$0xff] (!%p656_p13) }
  0x22   : > { %v304_v1 = vsel (!%p656_p13), %vm303_vm0, %v300_v0, 0.0 }
  0x23   : > { %305 = vadd.xlane.f32.xlu0 (!%p656_p13), %v304_v1 }
  0x24   : > { %v657_v11 = vld [vmem:[%s1168_s1] ss:$0 sm:$0xff] (!%p656_p13) }
  0xb0   : > { %v306_v2 = vpop.xlane.xlu0 %305 }
  0xb1   : > { %v308_v3 = vmul.f32 0.03125, %v306_v2 }
  0xb3   : > { %v309_v4 = vsub.f32 %v300_v0, %v308_v3 }
  0xb5   : > { %v310_v5 = vmul.f32 %v309_v4, %v309_v4 }
  0xb7   : > { %v311_v6 = vsel %vm303_vm0, %v310_v5, 0.0 }
  0xb8   : > { %312 = vadd.xlane.f32.xlu0 %v311_v6 }
 0x145   : > { %v313_v7 = vpop.xlane.xlu0 %312 }
 0x146   : > { %v314_v8 = vmul.f32 0.03125, %v313_v7 }
 0x148   : > { %v315_v9 = vadd.f32 1e-05, %v314_v8 }
 0x14a   : > { %793 = vrsqrt.f32 %v315_v9 }
 0x154   : > { %v794_v10 = vpop.eup %793 }
 0x155   : > { %v317_v12 = vmul.f32 %v794_v10, %v309_v4 }
 0x157   : > { %v324_v14 = vmul.f32 %v657_v11, %v317_v12 }
 0x159   : > { %v331_v15 = vadd.f32 %v658_v13, %v324_v14 }
 0x15b   : > { %332 = vst.msk [vmem:[#allocation2] sm:$0xff] %vm303_vm0, %v331_v15 }
 0x15c PF: > { %s659_s19 = sshll.u32 %s905_s24, 5  ;;  %v923_v16 = vmov 0.0|0.0   ;;  %vm924_vm1 = vmmov 0   ;;  %v925_v20 = vmov 0.0   ;;  %vm340_vm2 = vcmask 261120   ;;  %s664_s17 = sshll.u32 %s909_s25, 2 }
 0x15d   : > { %702 = vmatprep.subr.bf16.mxu0 %v923_v16  ;;  %708 = vmatprep.subr.bf16.mxu1 %v923_v16  ;;  %s335_s30 = scalar_lea.vmem %s1159_s3, %s659_s19  ;;  %s416_s0 = scalar_lea.vmem %s1160_s4, %s659_s19  ;;  %vm414_vm3 = vcmask 64512  }
 0x15e   : > { %v336_v17 = vld [vmem:[%s335_s30] sm:$0xff]  ;;  %v337_v18 = vld [vmem:[%s335_s30 + $0x8] sm:$0xff]  ;;  %688 = vmatprep.mubr.msk.f32.mxu0 %vm924_vm1, %v925_v20  ;;  %699 = vmatprep.mubr.msk.f32.mxu1 %vm924_vm1, %v925_v20  ;;  %v338_v23 = vld [vmem:[%s335_s30 + $0x10] sm:$0xff]  ;;  %s510_s18 = sadd.s32 %s905_s24, %s664_s17  ;;  %s514_s19 = sshll.u32 %s1043_s9, 4  ;;  %s1073_s19 = int_to_ptr.vmem [resolvable:$true] %s514_s19 }
 0x15f   : > { %v417_v19 = vld [vmem:[%s416_s0] sm:$0xff]  ;;  %v703_v21 = vpack.c.bf16 %v337_v18, %v336_v17  ;;  %v418_v22 = vld [vmem:[%s416_s0 + $0x8] sm:$0xff]  ;;  %v339_v24 = vld [vmem:[%s335_s30 + $0x18] sm:$0xff]  ;;  %s530_s20 = sshll.u32 %s1045_s12, 4  ;;  %s493_s24 = scalar_lea.sflag [#allocation4], %s1035_s16  ;;  %s1080_s20 = int_to_ptr.vmem [resolvable:$true] %s530_s20 }
 0x160   : > { %v709_v25 = vpack.c.bf16 %v418_v22, %v417_v19  ;;  %v419_v26 = vld [vmem:[%s416_s0 + $0x10] sm:$0xff]  ;;  %v420_v27 = vld [vmem:[%s416_s0 + $0x18] sm:$0xff]  ;;  %v706_v28 = vpack.c.bf16 %v339_v24, %v338_v23  ;;  %s665_s0 = sshll.u32 %s510_s18, 7  ;;  %s795_s17 = scalar_lea.vmem %s1073_s19, 128 }
 0x161   : > { %704 = vmatpush3.bf16.msra.mxu0 %v703_v21  ;;  %v712_v29 = vpack.c.bf16 %v420_v27, %v419_v26  ;;  %s1071_s13 = scalar_lea.hbm %s1161_s5, %s665_s0  ;;  %s1078_s25 = scalar_lea.hbm %s1162_s6, %s665_s0 }
 0x162   : > { %710 = vmatpush3.bf16.msra.mxu1 %v709_v25  ;;  %705 = vmatprep.subr.bf16.mxu0 %v923_v16  ;;  %v333_v30 = vld [vmem:[#allocation2] sm:$0xff]  ;;  %p796_p0 = scmp.ne.s32.totalorder %s1073_s19, %s795_s17  ;;  %s926_s18 = smov [#allocation3]  }
 0x163   : > { %711 = vmatprep.subr.bf16.mxu1 %v923_v16  ;;  %s799_s29 = sshll.u32 %s926_s18, 4  ;;  %s800_s29 = int_to_ptr.vmem [resolvable:$false] %s799_s29 }
 0x164   : > { %p797_p1 = pnand %p796_p0, %p1014_p3  ;;  %s801_s1 = scalar_lea.vmem %s800_s29, 256 }
 0x165   : > { %707 = vmatpush3.bf16.msra.mxu0 %v706_v28  ;;  %p802_p4 = scmp.lt.s32.totalorder %s1073_s19, %s800_s29  ;;  %p803_p5 = scmp.lt.s32.totalorder %s801_s1, %s795_s17 }
 0x166   : > { %713 = vmatpush3.bf16.msra.mxu1 %v712_v29  ;;  %p798_p2 = pneg %p797_p1 }
 0x167   : > { %p804_p6 = por %p803_p5, %p802_p4 }
 0x168   : > { %689 = vmatmul.mubr.msk.f32.vlgmr.msra.gmra.mrb[0].mxu0 %vm340_vm2, %v333_v30 }
 0x169   : > { %700 = vmatmul.mubr.msk.f32.vlgmr.msra.gmra.mrb[0].mxu1 %vm340_vm2, %v333_v30  ;;  %p805_p7 = pnand %p804_p6, %p798_p2 }
 0x23b   : > { %v410_v31 = vpop.f32.mrb[0].mxu0 }
 0x23c   : > { %415 = vst.msk [vmem:[%s1043_s9] sm:$0xff] %vm414_vm3, %v410_v31  ;;  %v487_v32 = vpop.f32.mrb[0].mxu1  ;;  %v690_v33 = vpop.f32.mrb[1].mxu0 }
 0x23d   : > { %491 = vst.msk [vmem:[%s1045_s12] sm:$0xff] %vm414_vm3, %v487_v32  ;;  %v701_v34 = vpop.f32.mrb[1].mxu1 }
 0x23e   : > { %808 = shalt.err (!%p805_p7)
}
 0x23f   : > { %s809_s9 = scalar_lea.hbm %s1071_s13, 128  ;;  %s813_s30 = scalar_lea.hbm %s1161_s5, 1024 }
 0x240   : > { %p810_p9 = scmp.ne.s32.totalorder %s1071_s13, %s809_s9  ;;  %p814_p12 = scmp.lt.u32.totalorder %s1071_s13, %s1161_s5 }
 0x241   : > { %p815_p13 = scmp.lt.u32.totalorder %s813_s30, %s809_s9  ;;  %p817_p1 = scmp.lt.u32.totalorder %s809_s9, %s1071_s13 }
 0x242   : > { %p811_p10 = pnand %p810_p9, %p1014_p3 }
 0x243   : > { %p816_p0 = por %p815_p13, %p814_p12 }
 0x244   : > { %p812_p11 = pneg %p811_p10 }
 0x245   : > { %p818_p2 = por %p817_p1, %p816_p0 }
 0x247   : > { %p819_p4 = pnand %p818_p2, %p812_p11 }
 0x249   : > { %822 = shalt.err (!%p819_p4)
}
 0x24a   : > { %714 = dma.vmem_to_hbm [thread:$0]  (%p1014_p3), %s1073_s19, 128, %s1071_s13, %s493_s24  }
 0x24b   : > { %s498_s17 = scalar_lea.sflag [#allocation6], %s1035_s16  ;;  %s823_s29 = scalar_lea.vmem %s1080_s20, 128 }
 0x24c   : > { %p824_p5 = scmp.ne.s32.totalorder %s1080_s20, %s823_s29  ;;  %s927_s1 = smov [#allocation5]  }
 0x24d   : > { %s827_s9 = sshll.u32 %s927_s1, 4  ;;  %s828_s9 = int_to_ptr.vmem [resolvable:$false] %s827_s9 }
 0x24e   : > { %p825_p6 = pnand %p824_p5, %p1014_p3  ;;  %s829_s12 = scalar_lea.vmem %s828_s9, 256 }
 0x24f   : > { %p830_p9 = scmp.lt.s32.totalorder %s1080_s20, %s828_s9  ;;  %p831_p10 = scmp.lt.s32.totalorder %s829_s12, %s823_s29 }
 0x250   : > { %p826_p7 = pneg %p825_p6 }
 0x251   : > { %p832_p11 = por %p831_p10, %p830_p9 }
 0x253   : > { %p833_p12 = pnand %p832_p11, %p826_p7 }
 0x255   : > { %836 = shalt.err (!%p833_p12)
}
 0x256   : > { %s837_s16 = scalar_lea.hbm %s1078_s25, 128  ;;  %s841_s24 = scalar_lea.hbm %s1162_s6, 1024 }
 0x257   : > { %p838_p13 = scmp.ne.s32.totalorder %s1078_s25, %s837_s16  ;;  %p842_p2 = scmp.lt.u32.totalorder %s1078_s25, %s1162_s6 }
 0x258   : > { %p843_p4 = scmp.lt.u32.totalorder %s841_s24, %s837_s16  ;;  %p845_p6 = scmp.lt.u32.totalorder %s837_s16, %s1078_s25 }
 0x259   : > { %p839_p0 = pnand %p838_p13, %p1014_p3 }
 0x25a   : > { %p844_p5 = por %p843_p4, %p842_p2 }
 0x25b   : > { %p840_p1 = pneg %p839_p0 }
 0x25c   : > { %p846_p7 = por %p845_p6, %p844_p5 }
 0x25e   : > { %p847_p9 = pnand %p846_p7, %p840_p1 }
 0x260   : > { %850 = shalt.err (!%p847_p9)
}
 0x261   : > { %715 = dma.vmem_to_hbm [thread:$0]  (%p1014_p3), %s1080_s20, 128, %s1078_s25, %s498_s17  }
 0x262 PF: > { %p725_p10 = scmp.ge.s32.totalorder %s921_s28, 2  ;;  %s542_s14 = sand.u32 1, %s893_s21  }
 0x263   : > { %s543_s18 = scalar_lea.sflag [#allocation4], %s542_s14 }
 0x264   : > { %p719_p11 = pnand %p725_p10, %p1023_p8 }
 0x266   : > { %884 = dma.done.wait (!%p719_p11), %s543_s18, 128  }
 0x267   : > { %886 = vsyncadd (!%p719_p11), %s543_s18, 4294967168  ;;  %s552_s29 = scalar_lea.sflag [#allocation6], %s542_s14 }
 0x268   : > { %888 = dma.done.wait (!%p719_p11), %s552_s29, 128  }
 0x269   : > { %890 = vsyncadd (!%p719_p11), %s552_s29, 4294967168  ;;  %s23_s28 = sadd.s32 1, %s921_s28   ;;  %s1169_s21 = smov %s897_s22 }
 0x26a   : > { %p20_p12 = scmp.ge.s32.totalorder %s23_s28, 10   ;;  %s1170_s22 = smov %s901_s23 }
 0x26b   : > { %s1171_s23 = smov %s1032_s15  ;;  %s1172_s24 = smov %s913_s26 }
 0x26c   : > { %s1173_s25 = smov %s917_s27  ;;  %s1174_s26 = smov %s1177_s7 }
 0x26d   : > { %s1175_s27 = smov %s1181_s8  ;;  %22 = sbr.rel (!%p20_p12) target bundleno = 10 (0xa), region = 98 }
 0x274   :  { %557 = vsyncpa [#allocation4], 1 }
 0x275   :  { %559 = vsyncpa [#allocation4 + $0x1], 1 }
 0x276   :  { %560 = vsyncpa [#allocation6], 1 }
 0x277   :  { %562 = vsyncpa [#allocation6 + $0x1], 1 }

</bundles_post_ra>
